<compile_context>
chip_gen: v7x
topology: tpu7x:2x2x1
jax: 0.10.0
libtpu: 0.0.40
codegen_flags: <defaults>
</compile_context>

<pallas_src>
import functools

import numpy as np
import jax
import jax.numpy as jnp
from jax.experimental import pallas as pl
from jax.experimental.pallas import tpu as pltpu

_LANE = 128
_SUB = 8


def _cdiv(a, b):
    return -(-a // b)


def _round_up(a, b):
    return _cdiv(a, b) * b


def _int_pow(x, n: int):
    """x ** n (n >= 1 integer) via square-and-multiply (pure VPU multiplies)."""
    result = None
    base = x
    while n > 0:
        if n & 1:
            result = base if result is None else result * base
        n >>= 1
        if n:
            base = base * base
    return result


def bessel_envelope_kernel(x_ref, o_ref, *, num_radial, inv_cutoff, p, a, b, c):
    x = x_ref[...]                                   # (TB, TS1, 128) f32, dense tiles
    ds = (x + 1e-6) * inv_cutoff                     # d_scaled

    # 1/d_scaled: approx EUP reciprocal + one Newton-Raphson step (rel err ~1e-7).
    r0 = pl.reciprocal(ds, approx=True)
    recip = r0 * (2.0 - ds * r0)

    # x^(p-1) via square-and-multiply when the exponent is integral; reuse for x^p, x^(p+1).
    pm1 = p - 1.0
    if float(pm1).is_integer() and pm1 >= 0.0:
        n = int(pm1)
        x_pm1 = jnp.ones_like(ds) if n == 0 else _int_pow(ds, n)
    else:
        x_pm1 = jnp.exp(pm1 * jnp.log(ds))           # non-integer exponent fallback (EUP)
    x_p = x_pm1 * ds
    x_pp1 = x_p * ds
    env = recip + a * x_pm1 + b * x_p + c * x_pp1
    d_cutoff = jnp.where(ds < 1.0, env, 0.0)         # smooth-cutoff envelope

    # sin(k*pi*d_scaled), k = 1..R, via the Chebyshev recurrence
    #   sin((k+1)t) = 2*cos(t)*sin(k t) - sin((k-1)t)
    # -> only 2 transcendentals per element; the R rows are VPU FMAs.
    theta = ds * np.float32(np.pi)
    s_k = jnp.sin(theta)                             # sin(1*theta)
    two_c = 2.0 * jnp.cos(theta)
    s_km1 = jnp.zeros_like(theta)                    # sin(0*theta)
    for k in range(num_radial):                      # static, small unrolled loop
        # k indexes an *outer* dim of the output block -> contiguous dense store.
        o_ref[:, k, :, :] = (d_cutoff * s_k).astype(o_ref.dtype)
        s_k, s_km1 = two_c * s_k - s_km1, s_k


def bessel_basis_layer_envelope(inputs, *, num_radial, cutoff, exponent,
                                target_block_bytes=4 << 20, out_dtype=jnp.float32):
    """(B, N, N) distances -> (B, num_radial, N, N), matching the PyTorch module."""
    B, N1, N2 = inputs.shape
    S = N1 * N2
    R = int(num_radial)

    p = float(exponent) + 1.0
    a = -(p + 1.0) * (p + 2.0) / 2.0
    b = p * (p + 2.0)
    c = -p * (p + 1.0) / 2.0

    # ---- tile selection -------------------------------------------------------------
    # Spatial axis re-factored as (S1 rows, 128 lanes).
    S1 = _cdiv(S, _LANE)

    # Row tile: full extent when small (any value is then legal for the 2nd-to-last block
    # dim), otherwise a multiple of 8 sized so one output block is ~target_block_bytes.
    max_rows = max(_SUB, (target_block_bytes // (R * _LANE * 4)) // _SUB * _SUB)
    if S1 <= max_rows:
        TS1, S1p = S1, S1
    else:
        n_chunks = _cdiv(S1, max_rows)
        TS1 = _round_up(_cdiv(S1, n_chunks), _SUB)
        S1p = n_chunks * TS1
    Sp = S1p * _LANE

    # Batch tile: as many batch rows as still fit the per-block budget.
    tb_max = max(1, target_block_bytes // (R * TS1 * _LANE * 4))
    n_b = _cdiv(B, tb_max)
    TB = _cdiv(B, n_b)
    Bp = n_b * TB

    # ---- pad (free-ish) and reshape so blocks are (sublane, lane)-dense ----------------
    x = inputs.reshape(B, S).astype(jnp.float32)
    if Bp != B or Sp != S:
        x = jnp.pad(x, ((0, Bp - B), (0, Sp - S)))       # zeros are numerically safe
    x = x.reshape(Bp, S1p, _LANE)

    kernel = functools.partial(
        bessel_envelope_kernel, num_radial=R,
        inv_cutoff=1.0 / float(cutoff), p=p, a=a, b=b, c=c)

    in_blk = TB * TS1 * _LANE * 4
    out_blk = TB * R * TS1 * _LANE * 4
    # double-buffered in/out blocks + live f32 intermediates + headroom; clamp to v7x VMEM.
    vmem_limit = int(min(max(2 * (in_blk + out_blk) + 10 * in_blk + (2 << 20), 32 << 20),
                         64 << 20))

    out = pl.pallas_call(
        kernel,
        out_shape=jax.ShapeDtypeStruct((Bp, R, S1p, _LANE), out_dtype),
        grid=(Bp // TB, S1p // TS1),
        in_specs=[pl.BlockSpec((TB, TS1, _LANE), lambda bi, si: (bi, si, 0))],
        out_specs=pl.BlockSpec((TB, R, TS1, _LANE), lambda bi, si: (bi, 0, si, 0)),
        compiler_params=pltpu.CompilerParams(
            dimension_semantics=("parallel", "parallel"),
            vmem_limit_bytes=vmem_limit),
    )(x)

    out = out.reshape(Bp, R, Sp)
    if Bp != B or Sp != S:
        out = out[:B, :, :S]                              # drop padding
    return out.reshape(B, R, N1, N2)


# --------------------------------------------------------------------------------------
# Pure-JAX reference (mirrors the PyTorch forward exactly) for verification
# --------------------------------------------------------------------------------------
def reference(inputs, *, num_radial, cutoff, exponent):
    p = exponent + 1.0
    a = -(p + 1.0) * (p + 2.0) / 2.0
    b = p * (p + 2.0)
    c = -p * (p + 1.0) / 2.0

    d = inputs[..., None] + 1e-6                          # (B, N, N, 1)
    d_scaled = d * (1.0 / cutoff)
    env = (1.0 / d_scaled + a * d_scaled ** (p - 1.0)
           + b * d_scaled ** p + c * d_scaled ** (p + 1.0))
    d_cutoff = jnp.where(d_scaled < 1.0, env, jnp.zeros_like(d_scaled))
    freqs = np.pi * jnp.arange(1, num_radial + 1, dtype=jnp.float32)
    out = d_cutoff * jnp.sin(freqs * d_scaled)            # (B, N, N, R)
    return jnp.transpose(out, (0, 3, 1, 2))               # (B, R, N, N)


# --------------------------------------------------------------------------------------
if __name__ == "__main__":
    key = jax.random.PRNGKey(0)
    cases = [
        dict(B=2, N=16, num_radial=8, cutoff=5.0, exponent=5.0),
        dict(B=1, N=10, num_radial=6, cutoff=4.0, exponent=5.0),  # exercises padding path
    ]
    for i, cs in enumerate(cases):
        k = jax.random.fold_in(key, i)
        inputs = jax.random.uniform(k, (cs["B"], cs["N"], cs["N"]), jnp.float32,
                                    minval=0.05, maxval=1.3 * cs["cutoff"])

        out = bessel_basis_layer_envelope(
            inputs, num_radial=cs["num_radial"], cutoff=cs["cutoff"],
            exponent=cs["exponent"])
        jax.block_until_ready(out)

        ref = reference(inputs, num_radial=cs["num_radial"], cutoff=cs["cutoff"],
                        exponent=cs["exponent"])
        # atol slightly above 1e-4: the Chebyshev sin-recurrence adds ~1e-5-level absolute
        # error that the envelope amplifies at small distances; rtol stays 1e-4.
        np.testing.assert_allclose(np.asarray(out), np.asarray(ref),
                                   rtol=1e-4, atol=2e-4)

    print("KERNEL_OK")
</pallas_src>

<mosaic_0001>
module attributes {stable_mosaic.version = 11 : i64} {
  func.func @bessel_envelope_kernel(%arg0: i32, %arg1: i32, %arg2: memref<2x2x128xf32, #tpu.memory_space<vmem>>, %arg3: memref<2x8x2x128xf32, #tpu.memory_space<vmem>>) attributes {dimension_semantics = [#tpu.dimension_semantics<parallel>, #tpu.dimension_semantics<parallel>], iteration_bounds = array<i64: 1, 1>, scalar_prefetch = 0 : i64, scratch_operands = 0 : i64, tpu.core_type = #tpu.core_type<tc>, window_params = [{transform_indices = @transform_0, window_bounds = array<i64: 2, 2, 128>}, {transform_indices = @transform_1, window_bounds = array<i64: 2, 8, 2, 128>}]} {
    %c0 = arith.constant 0 : index
    %c0_0 = arith.constant 0 : index
    %c0_1 = arith.constant 0 : index
    %0 = vector.load %arg2[%c0, %c0_0, %c0_1] : memref<2x2x128xf32, #tpu.memory_space<vmem>>, vector<2x2x128xf32>
    %cst = arith.constant 9.99999997E-7 : f32
    %1 = vector.broadcast %cst : f32 to vector<2x2x128xf32>
    %2 = arith.addf %0, %1 : vector<2x2x128xf32>
    %cst_2 = arith.constant 2.000000e-01 : f32
    %3 = vector.broadcast %cst_2 : f32 to vector<2x2x128xf32>
    %4 = arith.mulf %2, %3 : vector<2x2x128xf32>
    %5 = tpu.reciprocal %4 {approx = true} : vector<2x2x128xf32> -> vector<2x2x128xf32>
    %6 = arith.mulf %4, %5 : vector<2x2x128xf32>
    %cst_3 = arith.constant 2.000000e+00 : f32
    %7 = vector.broadcast %cst_3 : f32 to vector<2x2x128xf32>
    %8 = arith.subf %7, %6 : vector<2x2x128xf32>
    %9 = arith.mulf %5, %8 : vector<2x2x128xf32>
    %10 = arith.mulf %4, %4 : vector<2x2x128xf32>
    %11 = arith.mulf %10, %10 : vector<2x2x128xf32>
    %12 = arith.mulf %4, %11 : vector<2x2x128xf32>
    %13 = arith.mulf %12, %4 : vector<2x2x128xf32>
    %14 = arith.mulf %13, %4 : vector<2x2x128xf32>
    %cst_4 = arith.constant -2.800000e+01 : f32
    %15 = vector.broadcast %cst_4 : f32 to vector<2x2x128xf32>
    %16 = arith.mulf %15, %12 : vector<2x2x128xf32>
    %17 = arith.addf %9, %16 : vector<2x2x128xf32>
    %cst_5 = arith.constant 4.800000e+01 : f32
    %18 = vector.broadcast %cst_5 : f32 to vector<2x2x128xf32>
    %19 = arith.mulf %18, %13 : vector<2x2x128xf32>
    %20 = arith.addf %17, %19 : vector<2x2x128xf32>
    %cst_6 = arith.constant -2.100000e+01 : f32
    %21 = vector.broadcast %cst_6 : f32 to vector<2x2x128xf32>
    %22 = arith.mulf %21, %14 : vector<2x2x128xf32>
    %23 = arith.addf %20, %22 : vector<2x2x128xf32>
    %cst_7 = arith.constant 1.000000e+00 : f32
    %24 = vector.broadcast %cst_7 : f32 to vector<2x2x128xf32>
    %25 = arith.cmpf olt, %4, %24 : vector<2x2x128xf32>
    %cst_8 = arith.constant 0.000000e+00 : f32
    %26 = vector.broadcast %cst_8 : f32 to vector<2x2x128xf32>
    %27 = arith.select %25, %23, %26 : vector<2x2x128xi1>, vector<2x2x128xf32>
    %cst_9 = arith.constant 3.14159274 : f32
    %28 = vector.broadcast %cst_9 : f32 to vector<2x2x128xf32>
    %29 = arith.mulf %4, %28 : vector<2x2x128xf32>
    %30 = math.sin %29 : vector<2x2x128xf32>
    %31 = math.cos %29 : vector<2x2x128xf32>
    %cst_10 = arith.constant 2.000000e+00 : f32
    %32 = vector.broadcast %cst_10 : f32 to vector<2x2x128xf32>
    %33 = arith.mulf %32, %31 : vector<2x2x128xf32>
    %cst_11 = arith.constant 0.000000e+00 : f32
    %34 = vector.broadcast %cst_11 : f32 to vector<2x2x128xf32>
    %35 = arith.mulf %27, %30 : vector<2x2x128xf32>
    %c0_12 = arith.constant 0 : index
    %c0_13 = arith.constant 0 : index
    %c0_14 = arith.constant 0 : index
    %c0_15 = arith.constant 0 : index
    %36 = vector.load %arg3[%c0_12, %c0_13, %c0_14, %c0_15] : memref<2x8x2x128xf32, #tpu.memory_space<vmem>>, vector<2x1x2x128xf32>
    %37 = vector.shape_cast %36 : vector<2x1x2x128xf32> to vector<2x2x128xf32>
    %38 = vector.shape_cast %35 : vector<2x2x128xf32> to vector<2x1x2x128xf32>
    tpu.vector_store %arg3[%c0_12, %c0_13, %c0_14, %c0_15], %38 {strides = array<i32>} : memref<2x8x2x128xf32, #tpu.memory_space<vmem>>, vector<2x1x2x128xf32>,
    %39 = arith.mulf %33, %30 : vector<2x2x128xf32>
    %40 = arith.subf %39, %34 : vector<2x2x128xf32>
    %41 = arith.mulf %27, %40 : vector<2x2x128xf32>
    %c0_16 = arith.constant 0 : index
    %c1 = arith.constant 1 : index
    %c0_17 = arith.constant 0 : index
    %c0_18 = arith.constant 0 : index
    %42 = vector.load %arg3[%c0_16, %c1, %c0_17, %c0_18] : memref<2x8x2x128xf32, #tpu.memory_space<vmem>>, vector<2x1x2x128xf32>
    %43 = vector.shape_cast %42 : vector<2x1x2x128xf32> to vector<2x2x128xf32>
    %44 = vector.shape_cast %41 : vector<2x2x128xf32> to vector<2x1x2x128xf32>
    tpu.vector_store %arg3[%c0_16, %c1, %c0_17, %c0_18], %44 {strides = array<i32>} : memref<2x8x2x128xf32, #tpu.memory_space<vmem>>, vector<2x1x2x128xf32>,
    %45 = arith.mulf %33, %40 : vector<2x2x128xf32>
    %46 = arith.subf %45, %30 : vector<2x2x128xf32>
    %47 = arith.mulf %27, %46 : vector<2x2x128xf32>
    %c0_19 = arith.constant 0 : index
    %c2 = arith.constant 2 : index
    %c0_20 = arith.constant 0 : index
    %c0_21 = arith.constant 0 : index
    %48 = vector.load %arg3[%c0_19, %c2, %c0_20, %c0_21] : memref<2x8x2x128xf32, #tpu.memory_space<vmem>>, vector<2x1x2x128xf32>
    %49 = vector.shape_cast %48 : vector<2x1x2x128xf32> to vector<2x2x128xf32>
    %50 = vector.shape_cast %47 : vector<2x2x128xf32> to vector<2x1x2x128xf32>
    tpu.vector_store %arg3[%c0_19, %c2, %c0_20, %c0_21], %50 {strides = array<i32>} : memref<2x8x2x128xf32, #tpu.memory_space<vmem>>, vector<2x1x2x128xf32>,
    %51 = arith.mulf %33, %46 : vector<2x2x128xf32>
    %52 = arith.subf %51, %40 : vector<2x2x128xf32>
    %53 = arith.mulf %27, %52 : vector<2x2x128xf32>
    %c0_22 = arith.constant 0 : index
    %c3 = arith.constant 3 : index
    %c0_23 = arith.constant 0 : index
    %c0_24 = arith.constant 0 : index
    %54 = vector.load %arg3[%c0_22, %c3, %c0_23, %c0_24] : memref<2x8x2x128xf32, #tpu.memory_space<vmem>>, vector<2x1x2x128xf32>
    %55 = vector.shape_cast %54 : vector<2x1x2x128xf32> to vector<2x2x128xf32>
    %56 = vector.shape_cast %53 : vector<2x2x128xf32> to vector<2x1x2x128xf32>
    tpu.vector_store %arg3[%c0_22, %c3, %c0_23, %c0_24], %56 {strides = array<i32>} : memref<2x8x2x128xf32, #tpu.memory_space<vmem>>, vector<2x1x2x128xf32>,
    %57 = arith.mulf %33, %52 : vector<2x2x128xf32>
    %58 = arith.subf %57, %46 : vector<2x2x128xf32>
    %59 = arith.mulf %27, %58 : vector<2x2x128xf32>
    %c0_25 = arith.constant 0 : index
    %c4 = arith.constant 4 : index
    %c0_26 = arith.constant 0 : index
    %c0_27 = arith.constant 0 : index
    %60 = vector.load %arg3[%c0_25, %c4, %c0_26, %c0_27] : memref<2x8x2x128xf32, #tpu.memory_space<vmem>>, vector<2x1x2x128xf32>
    %61 = vector.shape_cast %60 : vector<2x1x2x128xf32> to vector<2x2x128xf32>
    %62 = vector.shape_cast %59 : vector<2x2x128xf32> to vector<2x1x2x128xf32>
    tpu.vector_store %arg3[%c0_25, %c4, %c0_26, %c0_27], %62 {strides = array<i32>} : memref<2x8x2x128xf32, #tpu.memory_space<vmem>>, vector<2x1x2x128xf32>,
    %63 = arith.mulf %33, %58 : vector<2x2x128xf32>
    %64 = arith.subf %63, %52 : vector<2x2x128xf32>
    %65 = arith.mulf %27, %64 : vector<2x2x128xf32>
    %c0_28 = arith.constant 0 : index
    %c5 = arith.constant 5 : index
    %c0_29 = arith.constant 0 : index
    %c0_30 = arith.constant 0 : index
    %66 = vector.load %arg3[%c0_28, %c5, %c0_29, %c0_30] : memref<2x8x2x128xf32, #tpu.memory_space<vmem>>, vector<2x1x2x128xf32>
    %67 = vector.shape_cast %66 : vector<2x1x2x128xf32> to vector<2x2x128xf32>
    %68 = vector.shape_cast %65 : vector<2x2x128xf32> to vector<2x1x2x128xf32>
    tpu.vector_store %arg3[%c0_28, %c5, %c0_29, %c0_30], %68 {strides = array<i32>} : memref<2x8x2x128xf32, #tpu.memory_space<vmem>>, vector<2x1x2x128xf32>,
    %69 = arith.mulf %33, %64 : vector<2x2x128xf32>
    %70 = arith.subf %69, %58 : vector<2x2x128xf32>
    %71 = arith.mulf %27, %70 : vector<2x2x128xf32>
    %c0_31 = arith.constant 0 : index
    %c6 = arith.constant 6 : index
    %c0_32 = arith.constant 0 : index
    %c0_33 = arith.constant 0 : index
    %72 = vector.load %arg3[%c0_31, %c6, %c0_32, %c0_33] : memref<2x8x2x128xf32, #tpu.memory_space<vmem>>, vector<2x1x2x128xf32>
    %73 = vector.shape_cast %72 : vector<2x1x2x128xf32> to vector<2x2x128xf32>
    %74 = vector.shape_cast %71 : vector<2x2x128xf32> to vector<2x1x2x128xf32>
    tpu.vector_store %arg3[%c0_31, %c6, %c0_32, %c0_33], %74 {strides = array<i32>} : memref<2x8x2x128xf32, #tpu.memory_space<vmem>>, vector<2x1x2x128xf32>,
    %75 = arith.mulf %33, %70 : vector<2x2x128xf32>
    %76 = arith.subf %75, %64 : vector<2x2x128xf32>
    %77 = arith.mulf %27, %76 : vector<2x2x128xf32>
    %c0_34 = arith.constant 0 : index
    %c7 = arith.constant 7 : index
    %c0_35 = arith.constant 0 : index
    %c0_36 = arith.constant 0 : index
    %78 = vector.load %arg3[%c0_34, %c7, %c0_35, %c0_36] : memref<2x8x2x128xf32, #tpu.memory_space<vmem>>, vector<2x1x2x128xf32>
    %79 = vector.shape_cast %78 : vector<2x1x2x128xf32> to vector<2x2x128xf32>
    %80 = vector.shape_cast %77 : vector<2x2x128xf32> to vector<2x1x2x128xf32>
    tpu.vector_store %arg3[%c0_34, %c7, %c0_35, %c0_36], %80 {strides = array<i32>} : memref<2x8x2x128xf32, #tpu.memory_space<vmem>>, vector<2x1x2x128xf32>,
    return
  }
  func.func @transform_0(%arg0: i32, %arg1: i32) -> (i32, i32, i32) {
    %c0_i32 = arith.constant 0 : i32
    %c0_i32_0 = arith.constant 0 : i32
    return %arg0, %arg1, %c0_i32 : i32, i32, i32
  }
  func.func @transform_1(%arg0: i32, %arg1: i32) -> (i32, i32, i32, i32) {
    %c0_i32 = arith.constant 0 : i32
    %c0_i32_0 = arith.constant 0 : i32
    %c0_i32_1 = arith.constant 0 : i32
    return %arg0, %c0_i32, %arg1, %c0_i32_0 : i32, i32, i32, i32
  }
}

</mosaic_0001>

<bundles_post_ra>
// kernel: tpu_custom_call.1
= control target key start
LH: loop header
LB: loop body
LE: loop exit
PB: predicated region body
PF: predicated region fallthrough
CT: control target
= control target key end

     0   :  { %6 = vsyncpa [#allocation3], 0  ;;  %s836_s0 = inlined_call_operand.hbm [shape: f32[2,2,128], index: 0, kind: input, shape index: {}]   ;;  %s837_s1 = inlined_call_operand.hbm [shape: f32[2,8,2,128], index: 1, kind: output, shape index: {}]  }
   0x1   :  { %7 = vsyncpa [#allocation4], 0  ;;  %s657_s6 = smov [#allocation2]   ;;  %s609_s10 = scalar_lea.hbm %s836_s0, 64 }
   0x2   :  { %s13_s7 = sshll.u32 %s657_s6, 4  ;;  %p610_p0 = scmp.ne.s32.totalorder %s836_s0, %s609_s10  ;;  %s14_s7 = int_to_ptr.vmem [resolvable:$true] %s13_s7 }
   0x3   :  { %p613_p1 = scmp.lt.u32.totalorder %s609_s10, %s836_s0 }
   0x5   :  { %p615_p2 = pnand %p613_p1, %p610_p0 }
   0x7   :  { %618 = shalt.err (!%p615_p2)
}
   0x8   :  { %s619_s15 = scalar_lea.vmem %s14_s7, 64  ;;  %p624_p4 = scmp.lt.s32.totalorder %s14_s7, %s14_s7 }
   0x9   :  { %p620_p3 = scmp.ne.s32.totalorder %s14_s7, %s619_s15  ;;  %p625_p5 = scmp.lt.s32.totalorder %s619_s15, %s619_s15 }
   0xb   :  { %p626_p6 = por %p625_p5, %p624_p4 }
   0xd   :  { %p627_p7 = pnand %p626_p6, %p620_p3 }
   0xf   :  { %630 = shalt.err (!%p627_p7)
}
  0x10   :  { %s658_s16 = smov 32   ;;  %s659_s17 = smov 2  }
  0x11   :  { %19 = dma.hbm_to_vmem [thread:$0]  %s836_s0, 64, %s14_s7, [#allocation3], %s658_s16, %s658_s16, %s659_s17  }
  0x12   :  { %653 = dma.done.wait [#allocation3], 64  }
  0x13   :  { %654 = vsyncadd [#allocation3], 4294967232  ;;  %v23_v0 = vld [vmem:[#allocation2] sm:$0x3]  ;;  %v24_v1 = vld [vmem:[#allocation2 + $0x2] sm:$0x3] }
  0x14   :  { %v25_v2 = vadd.f32 1e-06, %v23_v0  ;;  %v26_v3 = vadd.f32 1e-06, %v24_v1  ;;  %v660_v22 = vmov 683565275  }
  0x15   :  { %v661_v24 = vmov 2475754826   ;;  %v662_v26 = vmov 2131351028   ;;  %v663_v28 = vmov 2102212464  }
  0x16   :  { %v692_v4 = vmul.f32 0.2, %v25_v2  ;;  %v694_v5 = vmul.f32 0.2, %v26_v3  ;;  %v664_v30 = vmov 920167782  }
  0x17   :  { %v665_v38 = vmov 1326507024   ;;  %s666_s0 = smov [#allocation5]  }
  0x18   :  { %v697_v6 = vmul.f32 3.1415927, %v692_v4  ;;  %v700_v7 = vmul.f32 3.1415927, %v694_v5  ;;  %597 = vrcp.f32 %v692_v4  ;;  %s551_s20 = sshll.u32 %s666_s0, 4  ;;  %s552_s20 = int_to_ptr.vmem [resolvable:$true] %s551_s20 }
  0x19   :  { %599 = vrcp.f32 %v694_v5  ;;  %s631_s21 = scalar_lea.vmem %s552_s20, 512  ;;  %p636_p9 = scmp.lt.s32.totalorder %s552_s20, %s552_s20 }
  0x1a   :  { %v68_v8 = vand.u32 2139095040, %v697_v6  ;;  %v65_v9 = vand.u32 2147483647, %v697_v6  ;;  %v172_v11 = vand.u32 2139095040, %v700_v7  ;;  %v169_v58 = vand.u32 2147483647, %v700_v7  ;;  %p632_p8 = scmp.ne.s32.totalorder %s552_s20, %s631_s21  ;;  %p637_p10 = scmp.lt.s32.totalorder %s631_s21, %s631_s21 }
  0x1b   :  { %vm67_vm13 = vcmp.lt.s32.totalorder %v697_v6, 0 }
  0x1c   :  { %v69_v10 = vshrl.u32 %v68_v8, 23  ;;  %v72_v13 = vand.u32 8388607, %v65_v9  ;;  %v173_v15 = vshrl.u32 %v172_v11, 23  ;;  %v176_v2 = vand.u32 8388607, %v169_v58  ;;  %p638_p11 = por %p637_p10, %p636_p9 }
  0x1d   :  { %vm66_vm14 = vcmp.le.f32.partialorder %v65_v9, 0.7853982 }
  0x1e   :  { %v563_v12 = vadd.s32 4294967169, %v69_v10  ;;  %v73_v16 = vor.u32 8388608, %v72_v13  ;;  %v567_v20 = vadd.s32 4294967169, %v173_v15  ;;  %p639_p12 = pnand %p638_p11, %p632_p8 }
  0x20   :  { %v75_v14 = vadd.s32 1, %v563_v12  ;;  %v113_v32 = vshll.u32 %v73_v16, 8  ;;  %v179_v40 = vadd.s32 1, %v567_v20 }
  0x22   :  { %vm76_vm0 = vcmp.gt.s32.totalorder %v75_v14, 0  ;;  %vm180_vm5 = vcmp.gt.s32.totalorder %v179_v40, 0 }
  0x23   :  { %v77_v17 = vsel %vm76_vm0, %v75_v14, 0  ;;  %v181_v63 = vsel %vm180_vm5, %v179_v40, 0  ;;  %vm59_vm0 = vcmp.lt.f32.partialorder %v692_v4, 1.0 }
  0x24   :  { %v79_v18 = vand.u32 31, %v77_v17  ;;  %v78_v19 = vshrl.u32 %v77_v17, 5  ;;  %v183_v0 = vand.u32 31, %v181_v63  ;;  %v182_v14 = vshrl.u32 %v181_v63, 5 }
  0x26   :  { %v80_v21 = vsub.s32 32, %v79_v18  ;;  %v82_v23 = vshll.u32 %v660_v22, %v79_v18  ;;  %v85_v25 = vshll.u32 %v661_v24, %v79_v18  ;;  %v88_v27 = vshll.u32 %v662_v26, %v79_v18 }
  0x27   :  { %v91_v29 = vshll.u32 %v663_v28, %v79_v18  ;;  %v94_v31 = vshll.u32 %v664_v30, %v79_v18  ;;  %vm97_vm1 = vcmp.lt.s32.totalorder %v78_v19, 1  ;;  %vm98_vm2 = vcmp.lt.s32.totalorder %v78_v19, 2 }
  0x28   :  { %v81_v33 = vshrl.u32 %v660_v22, %v80_v21  ;;  %v83_v34 = vshrl.u32 %v661_v24, %v80_v21  ;;  %v86_v35 = vshrl.u32 %v662_v26, %v80_v21  ;;  %v89_v36 = vshrl.u32 %v663_v28, %v80_v21 }
  0x29   :  { %v92_v37 = vshrl.u32 %v664_v30, %v80_v21  ;;  %v95_v39 = vshrl.u32 %v665_v38, %v80_v21  ;;  %vm99_vm3 = vcmp.lt.s32.totalorder %v78_v19, 3  ;;  %vm100_vm4 = vcmp.lt.s32.totalorder %v78_v19, 4 }
  0x2a   :  { %v84_v41 = vor.u32 %v83_v34, %v82_v23  ;;  %v87_v42 = vor.u32 %v86_v35, %v85_v25  ;;  %v90_v43 = vor.u32 %v89_v36, %v88_v27  ;;  %v184_v8 = vsub.s32 32, %v183_v0 }
  0x2b   :  { %v93_v44 = vor.u32 %v92_v37, %v91_v29  ;;  %v96_v45 = vor.u32 %v95_v39, %v94_v31  ;;  %v186_v10 = vshll.u32 %v660_v22, %v183_v0  ;;  %v189_v11 = vshll.u32 %v661_v24, %v183_v0 }
  0x2c   :  { %v101_v46 = vsel %vm97_vm1, %v81_v33, %v84_v41  ;;  %v102_v47 = vsel %vm100_vm4, %v90_v43, 2102212464  ;;  %v105_v48 = vsel %vm97_vm1, %v84_v41, %v87_v42  ;;  %v109_v49 = vsel %vm97_vm1, %v87_v42, %v90_v43 }
  0x2d   :  { %v103_v50 = vsel %vm99_vm3, %v87_v42, %v102_v47  ;;  %v106_v51 = vsel %vm100_vm4, %v93_v44, 920167782  ;;  %v110_v52 = vsel %vm100_vm4, %v96_v45, 1326507024  ;;  %v192_v12 = vshll.u32 %v662_v26, %v183_v0 }
  0x2e   :  { %v107_v53 = vsel %vm99_vm3, %v90_v43, %v106_v51  ;;  %v111_v54 = vsel %vm99_vm3, %v93_v44, %v110_v52  ;;  %v104_v55 = vsel %vm98_vm2, %v101_v46, %v103_v50  ;;  %v187_v15 = vshrl.u32 %v661_v24, %v184_v8 }
  0x2f   :  { %v108_v56 = vsel %vm98_vm2, %v105_v48, %v107_v53  ;;  %v112_v57 = vsel %vm98_vm2, %v109_v49, %v111_v54  ;;  %v120_v1 = vmul.u32 %v113_v32, %v104_v55  ;;  %v190_v16 = vshrl.u32 %v662_v26, %v184_v8 }
  0x30   :  { %v713_v59 = vmul.u32.u64.low %v113_v32, %v112_v57  ;;  %v714_v60 = vmul.u32.u64.high %v113_v32, %v112_v57, %v713_v59  ;;  %v716_v61 = vmul.u32.u64.low %v113_v32, %v108_v56  ;;  %v717_v62 = vmul.u32.u64.high %v113_v32, %v108_v56, %v716_v61 }
  0x31   :  { %v177_v18 = vor.u32 8388608, %v176_v2  ;;  %v193_v19 = vshrl.u32 %v663_v28, %v184_v8  ;;  %v195_v20 = vshll.u32 %v663_v28, %v183_v0  ;;  %v188_v21 = vor.u32 %v187_v15, %v186_v10 }
  0x32   :  { %vm122_vm6 = vc.u32 %v714_v60, %v716_v61  ;;  %v123_v3 = vadd.s32 1, %v717_v62  ;;  %v191_v23 = vor.u32 %v190_v16, %v189_v11  ;;  %v196_v25 = vshrl.u32 %v664_v30, %v184_v8 }
  0x33   :  { %v198_v27 = vshll.u32 %v664_v30, %v183_v0  ;;  %v194_v31 = vor.u32 %v193_v19, %v192_v12  ;;  %v199_v32 = vshrl.u32 %v665_v38, %v184_v8  ;;  %v185_v33 = vshrl.u32 %v660_v22, %v184_v8 }
  0x34   :  { %v124_v13 = vsel %vm122_vm6, %v123_v3, %v717_v62  ;;  %v197_v34 = vor.u32 %v196_v25, %v195_v20  ;;  %vm201_vm7 = vcmp.lt.s32.totalorder %v182_v14, 1  ;;  %vm203_vm8 = vcmp.lt.s32.totalorder %v182_v14, 3 }
  0x35   :  { %v125_v17 = vadd.s32 %v124_v13, %v120_v1  ;;  %v200_v24 = vor.u32 %v199_v32, %v198_v27  ;;  %vm202_vm9 = vcmp.lt.s32.totalorder %v182_v14, 2  ;;  %vm204_vm10 = vcmp.lt.s32.totalorder %v182_v14, 4  ;;  %v598_v13 = vpop.eup %597 }
  0x36   :  { %v206_v26 = vsel %vm204_vm10, %v194_v31, 2102212464  ;;  %v209_v36 = vsel %vm201_vm7, %v188_v21, %v191_v23  ;;  %v210_v28 = vsel %vm204_vm10, %v197_v34, 920167782  ;;  %v217_v37 = vshll.u32 %v177_v18, 8 }
  0x37   :  { %v126_v29 = vadd.s32 536870912, %v125_v17  ;;  %v211_v30 = vsel %vm203_vm8, %v194_v31, %v210_v28  ;;  %v213_v40 = vsel %vm201_vm7, %v191_v23, %v194_v31  ;;  %v205_v38 = vsel %vm201_vm7, %v185_v33, %v188_v21 }
  0x38   :  { %v207_v22 = vsel %vm203_vm8, %v191_v23, %v206_v26  ;;  %v212_v41 = vsel %vm202_vm9, %v209_v36, %v211_v30  ;;  %v214_v42 = vsel %vm204_vm10, %v200_v24, 1326507024  ;;  %v121_v62 = vadd.s32 %v716_v61, %v714_v60 }
  0x39   :  { %v728_v35 = vshrl.u32 %v126_v29, 30  ;;  %v215_v44 = vsel %vm203_vm8, %v197_v34, %v214_v42  ;;  %v736_v46 = vmul.u32.u64.low %v217_v37, %v212_v41  ;;  %v737_v47 = vmul.u32.u64.high %v217_v37, %v212_v41, %v736_v46 }
  0x3a   :  { %v216_v45 = vsel %vm202_vm9, %v213_v40, %v215_v44  ;;  %v208_v49 = vsel %vm202_vm9, %v205_v38, %v207_v22  ;;  %v37_v1 = vmul.f32 %v692_v4, %v692_v4  ;;  %v31_v61 = vmul.f32 %v598_v13, %v692_v4 }
  0x3b   :  { %v128_v39 = vshll.u32 %v728_v35, 30  ;;  %v740_v50 = vmul.u32.u64.low %v217_v37, %v216_v45  ;;  %v741_v51 = vmul.u32.u64.high %v217_v37, %v216_v45, %v740_v50  ;;  %v224_v53 = vmul.u32 %v217_v37, %v208_v49 }
  0x3c   :  { %v227_v54 = vadd.s32 1, %v737_v47  ;;  %v39_v15 = vmul.f32 %v37_v1, %v37_v1  ;;  %v151_v25 = vsub.s32 4, %v728_v35  ;;  %v33_v29 = vsub.f32 2.0, %v31_v61 }
  0x3d   :  { %v129_v43 = vsub.s32 %v125_v17, %v128_v39  ;;  %vm226_vm11 = vc.u32 %v741_v51, %v736_v46  ;;  %v225_v40 = vadd.s32 %v736_v46, %v741_v51  ;;  %v38_v22 = vmul.f32 %v694_v5, %v694_v5 }
  0x3e   :  { %v228_v57 = vsel %vm226_vm11, %v227_v54, %v737_v47  ;;  %v41_v21 = vmul.f32 %v39_v15, %v692_v4  ;;  %v152_v24 = vsel %vm67_vm13, %v151_v25, %v728_v35  ;;  %v35_v36 = vmul.f32 %v598_v13, %v33_v29  ;;  %v600_v47 = vpop.eup %599 }
  0x3f   :  { %v131_v48 = vsub.s32 0, %v129_v43  ;;  %v229_v59 = vadd.s32 %v228_v57, %v224_v53  ;;  %v154_v30 = vsel %vm66_vm14, 0, %v152_v24  ;;  %v40_v50 = vmul.f32 %v38_v22, %v38_v22 }
  0x40   :  { %v43_v33 = vmul.f32 %v41_v21, %v692_v4  ;;  %v47_v28 = vmul.f32 -28.0, %v41_v21  ;;  %v158_v45 = vadd.s32 3, %v154_v30  ;;  %vm157_vm1 = vweird.f32 %v697_v6 }
  0x41   :  { %v564_v52 = vmin.u32 %v131_v48, %v129_v43  ;;  %v230_v0 = vadd.s32 536870912, %v229_v59  ;;  %vm774_vm2 = vcmp.le.f32.partialorder %v169_v58, 0.7853982  ;;  %vm171_vm3 = vcmp.lt.s32.totalorder %v700_v7, 0 }
  0x42   :  { %v45_v38 = vmul.f32 %v43_v33, %v692_v4  ;;  %v51_v44 = vmul.f32 48.0, %v43_v33  ;;  %v159_v54 = vand.u32 3, %v158_v45  ;;  %vm60_vm10 = vcmp.lt.f32.partialorder %v694_v5, 1.0 }
  0x43   :  { %v133_v55 = vclz %v564_v52  ;;  %v751_v10 = vshrl.u32 %v230_v0, 30 }
  0x44   :  { %v55_v46 = vmul.f32 -21.0, %v45_v38  ;;  %vm164_vm4 = vcmp.eq.s32.totalorder %v159_v54, 2  ;;  %vm161_vm6 = vcmp.eq.s32.totalorder %v159_v54, 0  ;;  %vm160_vm8 = vcmp.lt.s32.totalorder %v159_v54, 2 }
  0x45   :  { %v565_v56 = vadd.s32 4294967294, %v133_v55  ;;  %v232_v14 = vshll.u32 %v751_v10, 30  ;;  %v366_v55 = vand.u32 3, %v154_v30  ;;  %v255_v1 = vsub.s32 4, %v751_v10 }
  0x47   :  { %vm566_vm12 = vcmp.lt.s32.totalorder %v565_v56, 0  ;;  %v233_v60 = vsub.s32 %v229_v59, %v232_v14  ;;  %vm371_vm5 = vcmp.eq.s32.totalorder %v366_v55, 2  ;;  %vm368_vm7 = vcmp.eq.s32.totalorder %v366_v55, 0 }
  0x48   :  { %v136_v63 = vsel %vm566_vm12, 0, %v565_v56  ;;  %v32_v56 = vmul.f32 %v600_v47, %v694_v5  ;;  %vm367_vm9 = vcmp.lt.s32.totalorder %v366_v55, 2 }
  0x49   :  { %v137_v2 = vsub.s32 32, %v136_v63  ;;  %v138_v3 = vshll.u32 %v129_v43, %v136_v63  ;;  %v141_v8 = vsub.s32 4294967266, %v136_v63  ;;  %v235_v20 = vsub.s32 0, %v233_v60 }
  0x4a   :  { %v49_v43 = vadd.f32 %v47_v28, %v35_v36 }
  0x4b   :  { %v139_v11 = vshrl.u32 %v121_v62, %v137_v2  ;;  %v142_v12 = vadd.s32 127, %v141_v8  ;;  %v568_v27 = vmin.u32 %v235_v20, %v233_v60  ;;  %v42_v62 = vmul.f32 %v40_v50, %v694_v5 }
  0x4c   :  { %v53_v53 = vadd.f32 %v51_v44, %v49_v43  ;;  %v34_v8 = vsub.f32 2.0, %v32_v56 }
  0x4d   :  { %v140_v16 = vor.u32 %v139_v11, %v138_v3  ;;  %v143_v17 = vshll.u32 %v142_v12, 23  ;;  %v237_v32 = vclz %v568_v27  ;;  %v44_v14 = vmul.f32 %v42_v62, %v694_v5 }
  0x4e   :  { %v57_v3 = vadd.f32 %v55_v46, %v53_v53  ;;  %v48_v20 = vmul.f32 -28.0, %v42_v62  ;;  %v36_v25 = vmul.f32 %v600_v47, %v34_v8 }
  0x4f   :  { %v144_v18 = vor.u32 4788187, %v143_v17  ;;  %v147_v19 = vcvt.s32.f32 %v140_v16  ;;  %v569_v26 = vadd.s32 4294967294, %v237_v32 }
  0x50   :  { %v786_v61 = vsel %vm59_vm0, %v57_v3, 0.0  ;;  %v50_v24 = vadd.f32 %v48_v20, %v36_v25 }
  0x51   :  { %v145_v23 = vand.u32 2147483647, %v144_v18  ;;  %vm570_vm15 = vcmp.lt.s32.totalorder %v569_v26, 0 }
  0x52   :  { %v240_v9 = vsel %vm570_vm15, 0, %v569_v26  ;;  %v52_v26 = vmul.f32 48.0, %v44_v14 }
  0x53   :  { %v148_v31 = vmul.f32 %v147_v19, %v145_v23  ;;  %v241_v41 = vsub.s32 32, %v240_v9  ;;  %v242_v35 = vshll.u32 %v233_v60, %v240_v9  ;;  %v245_v42 = vsub.s32 4294967266, %v240_v9 }
  0x54   :  { %v256_v60 = vsel %vm171_vm3, %v255_v1, %v751_v10  ;;  %v54_v30 = vadd.f32 %v52_v26, %v50_v24 }
  0x55   :  { %v149_v34 = vxor.u32 2147483648, %v148_v31  ;;  %v243_v48 = vshrl.u32 %v225_v40, %v241_v41  ;;  %v246_v49 = vadd.s32 127, %v245_v42  ;;  %v258_v10 = vsel %vm774_vm2, 0, %v256_v60 }
  0x56   :  { %v469_v38 = vand.u32 3, %v258_v10 }
  0x57   :  { %v150_v37 = vsel %vm67_vm13, %v149_v34, %v148_v31  ;;  %v244_v51 = vor.u32 %v243_v48, %v242_v35  ;;  %v247_v52 = vshll.u32 %v246_v49, 23  ;;  %v46_v34 = vmul.f32 %v44_v14, %v694_v5 }
  0x58   :  { %v153_v39 = vsel %vm66_vm14, %v697_v6, %v150_v37  ;;  %v262_v6 = vadd.s32 3, %v258_v10  ;;  %vm474_vm12 = vcmp.eq.s32.totalorder %v469_v38, 2  ;;  %vm470_vm14 = vcmp.lt.s32.totalorder %v469_v38, 2 }
  0x59   :  { %601 = vcosq.f32 %v153_v39  ;;  %v248_v57 = vor.u32 4788187, %v247_v52  ;;  %v251_v59 = vcvt.s32.f32 %v244_v51  ;;  %vm471_vm15 = vcmp.eq.s32.totalorder %v469_v38, 0 }
  0x5a   :  { %603 = vsinq.f32 %v153_v39  ;;  %v56_v39 = vmul.f32 -21.0, %v46_v34  ;;  %v263_v40 = vand.u32 3, %v262_v6 }
  0x5b   :  { %v249_v0 = vand.u32 2147483647, %v248_v57 }
  0x5c   :  { %v58_v42 = vadd.f32 %v56_v39, %v54_v30  ;;  %vm268_vm11 = vcmp.eq.s32.totalorder %v263_v40, 2  ;;  %vm265_vm13 = vcmp.eq.s32.totalorder %v263_v40, 0  ;;  %vm264_vm0 = vcmp.lt.s32.totalorder %v263_v40, 2 }
  0x5d   :  { %v252_v13 = vmul.f32 %v251_v59, %v249_v0 }
  0x5e   :  { %v62_v51 = vsel %vm60_vm10, %v58_v42, 0.0 }
  0x5f   :  { %v253_v17 = vxor.u32 2147483648, %v252_v13 }
  0x61   :  { %v254_v27 = vsel %vm171_vm3, %v253_v17, %v252_v13 }
  0x62   :  { %v257_v4 = vsel %vm774_vm2, %v700_v7, %v254_v27 }
  0x63   :  { %v602_v2 = vpop.eup %601  ;;  %605 = vcosq.f32 %v257_v4 }
  0x64   :  { %v604_v11 = vpop.eup %603  ;;  %v165_v12 = vxor.u32 2147483648, %v602_v2  ;;  %607 = vsinq.f32 %v257_v4 }
  0x65   :  { %v162_v58 = vxor.u32 2147483648, %v604_v11 }
  0x66   :  { %v166_v15 = vsel %vm164_vm4, %v165_v12, %v604_v11  ;;  %v373_v16 = vsel %vm371_vm5, %v165_v12, %v604_v11 }
  0x67   :  { %v163_v18 = vsel %vm161_vm6, %v602_v2, %v162_v58  ;;  %v370_v19 = vsel %vm368_vm7, %v602_v2, %v162_v58 }
  0x68   :  { %v167_v21 = vsel %vm160_vm8, %v163_v18, %v166_v15  ;;  %v374_v23 = vsel %vm367_vm9, %v370_v19, %v373_v16 }
  0x69   :  { %v168_v29 = vsel %vm157_vm1, nan, %v167_v21  ;;  %v375_v31 = vsel %vm157_vm1, nan, %v374_v23  ;;  %vm261_vm1 = vweird.f32 %v700_v7 }
  0x6a   :  { %v799_v32 = vmul.f32 2.0, %v375_v31  ;;  %v481_v33 = vmul.f32 %v168_v29, %v786_v61 }
  0x6c   :  { %483 = vst [vmem:[#allocation5] sm:$0x3] %v481_v33  ;;  %v485_v36 = vmul.f32 %v799_v32, %v168_v29 }
  0x6d   :  { %v606_v35 = vpop.eup %605 }
  0x6e   :  { %v487_v28 = vmul.f32 %v485_v36, %v786_v61  ;;  %v492_v37 = vmul.f32 %v485_v36, %v799_v32  ;;  %v608_v44 = vpop.eup %607  ;;  %v269_v45 = vxor.u32 2147483648, %v606_v35 }
  0x6f   :  { %v266_v47 = vxor.u32 2147483648, %v608_v44 }
  0x70   :  { %490 = vst [vmem:[#allocation5 + $0x2] sm:$0x3] %v487_v28  ;;  %v494_v22 = vsub.f32 %v492_v37, %v168_v29  ;;  %v270_v50 = vsel %vm268_vm11, %v269_v45, %v608_v44  ;;  %v476_v46 = vsel %vm474_vm12, %v269_v45, %v608_v44 }
  0x71   :  { %v267_v52 = vsel %vm265_vm13, %v606_v35, %v266_v47  ;;  %v473_v53 = vsel %vm471_vm15, %v606_v35, %v266_v47 }
  0x72   :  { %v496_v9 = vmul.f32 %v494_v22, %v786_v61  ;;  %v501_v41 = vmul.f32 %v494_v22, %v799_v32  ;;  %v271_v55 = vsel %vm264_vm0, %v267_v52, %v270_v50  ;;  %v477_v56 = vsel %vm470_vm14, %v473_v53, %v476_v46 }
  0x73   :  { %v272_v57 = vsel %vm261_vm1, nan, %v271_v55  ;;  %v478_v59 = vsel %vm261_vm1, nan, %v477_v56 }
  0x74   :  { %499 = vst [vmem:[#allocation5 + $0x4] sm:$0x3] %v496_v9  ;;  %v503_v43 = vsub.f32 %v501_v41, %v485_v36  ;;  %v480_v0 = vmul.f32 2.0, %v478_v59  ;;  %v482_v1 = vmul.f32 %v272_v57, %v62_v51 }
  0x76   :  { %v505_v48 = vmul.f32 %v503_v43, %v786_v61  ;;  %v510_v49 = vmul.f32 %v503_v43, %v799_v32  ;;  %484 = vst [vmem:[#allocation5 + $0x10] sm:$0x3] %v482_v1  ;;  %v486_v2 = vmul.f32 %v480_v0, %v272_v57 }
  0x78   :  { %508 = vst [vmem:[#allocation5 + $0x6] sm:$0x3] %v505_v48  ;;  %v512_v54 = vsub.f32 %v510_v49, %v494_v22  ;;  %v488_v8 = vmul.f32 %v486_v2, %v62_v51  ;;  %v493_v11 = vmul.f32 %v486_v2, %v480_v0 }
  0x7a   :  { %v514_v62 = vmul.f32 %v512_v54, %v786_v61  ;;  %v519_v63 = vmul.f32 %v512_v54, %v799_v32  ;;  %491 = vst [vmem:[#allocation5 + $0x12] sm:$0x3] %v488_v8  ;;  %v495_v13 = vsub.f32 %v493_v11, %v272_v57 }
  0x7c   :  { %517 = vst [vmem:[#allocation5 + $0x8] sm:$0x3] %v514_v62  ;;  %v521_v7 = vsub.f32 %v519_v63, %v503_v43  ;;  %v497_v15 = vmul.f32 %v495_v13, %v62_v51  ;;  %v502_v16 = vmul.f32 %v495_v13, %v480_v0 }
  0x7e   :  { %v523_v5 = vmul.f32 %v521_v7, %v786_v61  ;;  %v528_v3 = vmul.f32 %v521_v7, %v799_v32  ;;  %500 = vst [vmem:[#allocation5 + $0x14] sm:$0x3] %v497_v15  ;;  %v504_v60 = vsub.f32 %v502_v16, %v486_v2 }
  0x80   :  { %526 = vst [vmem:[#allocation5 + $0xa] sm:$0x3] %v523_v5  ;;  %v530_v12 = vsub.f32 %v528_v3, %v512_v54  ;;  %v506_v19 = vmul.f32 %v504_v60, %v62_v51  ;;  %v511_v20 = vmul.f32 %v504_v60, %v480_v0 }
  0x82   :  { %v532_v58 = vmul.f32 %v530_v12, %v786_v61  ;;  %v537_v14 = vmul.f32 %v530_v12, %v799_v32  ;;  %509 = vst [vmem:[#allocation5 + $0x16] sm:$0x3] %v506_v19  ;;  %v513_v21 = vsub.f32 %v511_v20, %v495_v13 }
  0x84   :  { %535 = vst [vmem:[#allocation5 + $0xc] sm:$0x3] %v532_v58  ;;  %v539_v17 = vsub.f32 %v537_v14, %v521_v7  ;;  %v515_v23 = vmul.f32 %v513_v21, %v62_v51  ;;  %v520_v25 = vmul.f32 %v513_v21, %v480_v0 }
  0x86   :  { %v541_v18 = vmul.f32 %v539_v17, %v786_v61  ;;  %518 = vst [vmem:[#allocation5 + $0x18] sm:$0x3] %v515_v23  ;;  %v522_v27 = vsub.f32 %v520_v25, %v504_v60 }
  0x88   :  { %544 = vst [vmem:[#allocation5 + $0xe] sm:$0x3] %v541_v18  ;;  %v524_v29 = vmul.f32 %v522_v27, %v62_v51  ;;  %v529_v31 = vmul.f32 %v522_v27, %v480_v0 }
  0x8a   :  { %527 = vst [vmem:[#allocation5 + $0x1a] sm:$0x3] %v524_v29  ;;  %v531_v4 = vsub.f32 %v529_v31, %v513_v21 }
  0x8c   :  { %v533_v10 = vmul.f32 %v531_v4, %v62_v51  ;;  %v538_v32 = vmul.f32 %v531_v4, %v480_v0 }
  0x8e   :  { %536 = vst [vmem:[#allocation5 + $0x1c] sm:$0x3] %v533_v10  ;;  %v540_v33 = vsub.f32 %v538_v32, %v522_v27 }
  0x90   :  { %v542_v61 = vmul.f32 %v540_v33, %v62_v51 }
  0x92   :  { %545 = vst [vmem:[#allocation5 + $0x1e] sm:$0x3] %v542_v61 }
  0x93   :  { %642 = shalt.err (!%p639_p12)
}
  0x94   :  { %s643_s24 = scalar_lea.hbm %s837_s1, 512 }
  0x95   :  { %p644_p13 = scmp.ne.s32.totalorder %s837_s1, %s643_s24  ;;  %p647_p0 = scmp.lt.u32.totalorder %s643_s24, %s837_s1 }
  0x97   :  { %p649_p1 = pnand %p647_p0, %p644_p13 }
  0x99   :  { %652 = shalt.err (!%p649_p1)
}
  0x9a   :  { %557 = dma.vmem_to_hbm [thread:$0]  %s552_s20, 512, %s837_s1, [#allocation4], %s658_s16, %s658_s16, %s659_s17  }
  0x9b   :  { %655 = dma.done.wait [#allocation4], 512  }
  0x9c   :  { %656 = vsyncadd [#allocation4], 4294966784 }
  0x9d   :  { %561 = vsyncpa [#allocation3], 1 }
  0x9e   :  { %562 = vsyncpa [#allocation4], 1 }

</bundles_post_ra>
